<compile_context>
chip_gen: v5e
topology: v5e:2x2
jax: 0.10.0
libtpu: 0.0.40
codegen_flags: <defaults>
</compile_context>

<pallas_src>
from functools import partial

import jax
import jax.numpy as jnp
from jax.experimental import pallas as pl
from jax.experimental.pallas import tpu as pltpu

_SQRT1_2 = 0.7071067811865476  # 1/sqrt(2)


# ---------------------------------------------------------------------------
# hardware / tiling helpers
# ---------------------------------------------------------------------------
def _vmem_limit_bytes():
    """Per-generation scoped-VMEM limit: ~3/4 of physical (v5e/v6e: 128 MiB, v7x: 64 MiB)."""
    phys = None
    try:
        phys = getattr(pltpu.get_tpu_info(), "vmem_capacity_bytes", None)
    except Exception:
        phys = None
    if not phys:
        phys = 64 * 1024 * 1024
    return int(min(phys * 3 // 4, 100 * 1024 * 1024))


def _attn_plan(N, C, budget_bytes, batch):
    """Choose attention impl + q tile.  Resident-KV single-pass softmax when the whole token
    set fits comfortably in VMEM, flash-tiled online softmax otherwise."""
    div8 = [t for t in range(8, N + 1, 8) if N % t == 0]
    cands = [t for t in div8 if t <= 256] or div8[:1] or [N]
    if batch == 1:                              # keep both v7x TensorCores busy at batch 1
        multi = [t for t in cands if N // t >= 2]
        if multi:
            cands = multi

    def resident_bytes(t):
        # f32 worst case: resident KV (double-buffered) + q/out tiles + scores/probs + result
        return 4 * (2 * N * C + 4 * t * C + 2 * t * N + t * C + t * N)

    fitting = [t for t in cands if resident_bytes(t) <= budget_bytes]
    if fitting:
        return "resident", max(fitting)
    # TODO(synk): the flash fallback tile is not itself budget-checked against the tq*tk scores.
    return "flash", max(cands)


def _pick_row_group(H4, W, C, Cout, budget_bytes, batch):
    """Pick g = number of superpatch rows per kernel-B step (pixel tile TP = g*4*W lanes).
    Requires H4 % g == 0 and TP % 128 == 0 (or full image); VMEM-budget aware."""
    W4 = W // 4

    def vmem_est(g):
        tp, gw4 = g * 4 * W, g * W4
        return 4 * (2 * C * tp            # x tile, double-buffered
                    + 2 * gw4 * C         # attention-token tile
                    + 2 * gw4 * tp        # upsample matrix
                    + 2 * Cout * tp       # output tile
                    + 4 * Cout * C        # weight slabs
                    + 2 * (C + Cout) * tp)  # intermediates

    valid = [g for g in range(1, H4 + 1)
             if H4 % g == 0 and ((g * 4 * W) % 128 == 0 or g == H4)]
    if batch == 1:                              # keep both v7x TensorCores busy at batch 1
        multi = [g for g in valid if H4 // g >= 2]
        if multi:
            valid = multi
    fitting = [g for g in valid if vmem_est(g) <= budget_bytes]
    return max(fitting) if fitting else min(valid)


def _build_upsample_matrix(g, W4, W, dtype):
    """0/1 matrix U of shape (g*W4, g*4*W): U[t, p] = 1 iff image pixel p (within one group of
    g superpatch rows) lies inside superpatch token t.  Used to do the 4x4 nearest-neighbour
    upsample as an MXU matmul (no lane-dim reshapes in the kernel)."""
    gw4, tp = g * W4, g * 4 * W
    t = jnp.arange(gw4)
    t_row, t_col = t // W4, t % W4
    p = jnp.arange(tp)
    p_row = p // (4 * W)            # superpatch row within the tile
    p_col = (p % W) // 4            # superpatch column
    u = (t_row[:, None] == p_row[None, :]) & (t_col[:, None] == p_col[None, :])
    return u.astype(dtype)


# ---------------------------------------------------------------------------
# Kernel A (default): resident-KV single-pass softmax over the superpatch tokens
# ---------------------------------------------------------------------------
def _attn_resident_kernel(q_ref, kv_ref, o_ref, *, scale, compute_dtype):
    # fold the softmax scale into q (O(tq*C) multiplies instead of scaling the (tq,N) scores)
    q = (q_ref[0].astype(jnp.float32) * scale).astype(compute_dtype)    # (tq, C)
    k = kv_ref[0].astype(compute_dtype)                                 # (N, C), resident (= V)

    s = jax.lax.dot_general(q, k, (((1,), (1,)), ((), ())),
                            preferred_element_type=jnp.float32)         # (tq, N)
    m = jnp.max(s, axis=-1, keepdims=True)
    p = jnp.exp(s - m)
    l = jnp.sum(p, axis=-1, keepdims=True)
    o = jnp.dot(p.astype(compute_dtype), k, preferred_element_type=jnp.float32)  # (tq, C)
    o_ref[0] = (o / l).astype(o_ref.dtype)


# ---------------------------------------------------------------------------
# Kernel A (fallback): flash-tiled online-softmax attention for very large N*C
# ---------------------------------------------------------------------------
def _attn_flash_kernel(q_ref, kv_ref, o_ref, m_sc, l_sc, acc_sc, *, scale, compute_dtype):
    kv_i = pl.program_id(2)

    @pl.when(kv_i == 0)
    def _():
        m_sc[...] = jnp.full(m_sc.shape, -jnp.inf, jnp.float32)
        l_sc[...] = jnp.zeros(l_sc.shape, jnp.float32)
        acc_sc[...] = jnp.zeros(acc_sc.shape, jnp.float32)

    q = (q_ref[0].astype(jnp.float32) * scale).astype(compute_dtype)    # (tq, C)
    k = kv_ref[0].astype(compute_dtype)                                 # (tk, C), also used as V

    s = jax.lax.dot_general(q, k, (((1,), (1,)), ((), ())),
                            preferred_element_type=jnp.float32)         # (tq, tk)

    m_prev = m_sc[...]
    m_new = jnp.maximum(m_prev, jnp.max(s, axis=-1, keepdims=True))
    alpha = jnp.exp(m_prev - m_new)
    p = jnp.exp(s - m_new)
    l_sc[...] = alpha * l_sc[...] + jnp.sum(p, axis=-1, keepdims=True)
    acc_sc[...] = alpha * acc_sc[...] + jnp.dot(p.astype(compute_dtype), k,
                                                preferred_element_type=jnp.float32)
    m_sc[...] = m_new

    @pl.when(kv_i == pl.num_programs(2) - 1)
    def _():
        o_ref[0] = (acc_sc[...] / l_sc[...]).astype(o_ref.dtype)


# ---------------------------------------------------------------------------
# Kernel B: fused 1x1 conv (split weights, folded BN/bias) + MXU upsample + exact GELU,
#           computed in NCHW form (channels on sublanes, pixels on lanes; lane-dense stores)
# ---------------------------------------------------------------------------
def _conv_bn_gelu_kernel(x_ref, a_ref, u_ref, wxt_ref, wa_ref, b_ref, o_ref, *, compute_dtype):
    x = x_ref[0].astype(compute_dtype)          # (C, TP)     image pixels of g superpatch rows
    a = a_ref[0].astype(compute_dtype)          # (g*W4, C)   matching low-res attention tokens
    u = u_ref[...].astype(compute_dtype)        # (g*W4, TP)  0/1 nearest-upsample matrix
    wxt = wxt_ref[...].astype(compute_dtype)    # (Cout, C)
    wa = wa_ref[...].astype(compute_dtype)      # (C, Cout)

    # x contribution
    yx = jnp.dot(wxt, x, preferred_element_type=jnp.float32)            # (Cout, TP)

    # attention contribution: project the tokens at low resolution, then 4x4 nearest-upsample
    # the projected result on the MXU (z^T @ U) -- no HBM-staged upsample, no lane reshapes.
    z = jnp.dot(a, wa, preferred_element_type=jnp.float32)              # (g*W4, Cout)
    ya = jax.lax.dot_general(z.astype(compute_dtype), u, (((0,), (0,)), ((), ())),
                             preferred_element_type=jnp.float32)        # (Cout, TP)

    y = yx + ya + b_ref[...]                                            # + folded BN/conv bias
    y = 0.5 * y * (1.0 + jax.lax.erf(y * _SQRT1_2))                     # exact (erf) GELU
    o_ref[0] = y.astype(o_ref.dtype)


# ---------------------------------------------------------------------------
# Public wrapper: NCHW in, NCHW out (PyTorch convention), eval-mode BatchNorm
# ---------------------------------------------------------------------------
def mrconv4dsp_forward(x_nchw, params, *, eps=1e-5, use_bf16=True,
                       attn_impl="auto", attn_tile=None):
    B, C, H, W = x_nchw.shape
    # TODO(synk): general F.interpolate('nearest') semantics for H, W not divisible by 4.
    assert H % 4 == 0 and W % 4 == 0, "superpatch stride-4 path requires H, W divisible by 4"
    H4, W4 = H // 4, W // 4
    N = H4 * W4

    x = x_nchw.astype(jnp.float32)
    compute_dtype = jnp.bfloat16 if use_bf16 else jnp.float32
    att_dtype = jnp.bfloat16 if use_bf16 else jnp.float32

    vmem_limit = _vmem_limit_bytes()
    budget = int(vmem_limit * 0.6)

    # --- superpatch token selection: only N*C elements are relaid out (1/16 of x) ---
    tokens = jnp.transpose(x[:, :, ::4, ::4].reshape(B, C, N), (0, 2, 1))   # (B, N, C)
    scale = float(C) ** -0.5

    # --- kernel A: self-attention over the N superpatch tokens ---
    impl, tq = _attn_plan(N, C, budget, B)
    if attn_impl != "auto":
        impl = attn_impl
    if attn_tile is not None:
        assert N % attn_tile == 0
        tq = attn_tile

    if impl == "resident":
        att = pl.pallas_call(
            partial(_attn_resident_kernel, scale=scale, compute_dtype=compute_dtype),
            out_shape=jax.ShapeDtypeStruct((B, N, C), att_dtype),
            grid=(B, N // tq),
            in_specs=[
                pl.BlockSpec((1, tq, C), lambda b, qi: (b, qi, 0)),   # q tile
                pl.BlockSpec((1, N, C), lambda b, qi: (b, 0, 0)),     # resident K (= V)
            ],
            out_specs=pl.BlockSpec((1, tq, C), lambda b, qi: (b, qi, 0)),
            compiler_params=pltpu.CompilerParams(
                dimension_semantics=("parallel", "parallel"),
                vmem_limit_bytes=vmem_limit),
        )(tokens, tokens)
    else:
        tk = tq
        att = pl.pallas_call(
            partial(_attn_flash_kernel, scale=scale, compute_dtype=compute_dtype),
            out_shape=jax.ShapeDtypeStruct((B, N, C), att_dtype),
            grid=(B, N // tq, N // tk),
            in_specs=[
                pl.BlockSpec((1, tq, C), lambda b, qi, ki: (b, qi, 0)),   # q tile
                pl.BlockSpec((1, tk, C), lambda b, qi, ki: (b, ki, 0)),   # k (= v) tile
            ],
            out_specs=pl.BlockSpec((1, tq, C), lambda b, qi, ki: (b, qi, 0)),
            scratch_shapes=[
                pltpu.VMEM((tq, 1), jnp.float32),    # running max  m
                pltpu.VMEM((tq, 1), jnp.float32),    # running sum  l
                pltpu.VMEM((tq, C), jnp.float32),    # accumulator
            ],
            compiler_params=pltpu.CompilerParams(
                dimension_semantics=("parallel", "parallel", "arbitrary"),
                vmem_limit_bytes=vmem_limit),
        )(tokens, tokens)

    # --- fold BatchNorm (eval) and the conv bias into the 1x1-conv weights ---
    w = params["w"].astype(jnp.float32)                               # (2C, Cout)
    s_bn = params["gamma"] * jax.lax.rsqrt(params["var"] + eps)       # (1, Cout)
    w_eff = w * s_bn
    b_eff = (params["b"] - params["mean"]) * s_bn + params["beta"]    # (1, Cout)
    Cout = w_eff.shape[1]
    wxt = jnp.transpose(w_eff[:C])                                    # (Cout, C)  for Wx^T @ x
    wa = w_eff[C:]                                                    # (C, Cout)  token projection
    b_col = jnp.reshape(b_eff, (Cout, 1))                             # broadcasts over pixel lanes

    # --- kernel B: g superpatch rows (= 4g image rows = g*4*W pixels) per grid step ---
    g = _pick_row_group(H4, W, C, Cout, budget, B)
    TP = g * 4 * W
    u_mat = _build_upsample_matrix(g, W4, W, compute_dtype)           # (g*W4, TP), resident

    x3 = x.reshape(B, C, H * W)                 # free reshape: merge trailing contiguous dims
    out3 = pl.pallas_call(
        partial(_conv_bn_gelu_kernel, compute_dtype=compute_dtype),
        out_shape=jax.ShapeDtypeStruct((B, Cout, H * W), jnp.float32),
        grid=(B, H4 // g),
        in_specs=[
            pl.BlockSpec((1, C, TP), lambda b, r: (b, 0, r)),         # x pixels (lane-dense)
            pl.BlockSpec((1, g * W4, C), lambda b, r: (b, r, 0)),     # low-res attention tokens
            pl.BlockSpec((g * W4, TP), lambda b, r: (0, 0)),          # upsample matrix
            pl.BlockSpec((Cout, C), lambda b, r: (0, 0)),             # Wx^T
            pl.BlockSpec((C, Cout), lambda b, r: (0, 0)),             # Wa
            pl.BlockSpec((Cout, 1), lambda b, r: (0, 0)),             # folded bias
        ],
        out_specs=pl.BlockSpec((1, Cout, TP), lambda b, r: (b, 0, r)),
        compiler_params=pltpu.CompilerParams(
            dimension_semantics=("parallel", "parallel"),
            vmem_limit_bytes=vmem_limit),
    )(x3, att, u_mat, wxt, wa, b_col)

    return out3.reshape(B, Cout, H, W)          # free reshape: split trailing contiguous dim


# ---------------------------------------------------------------------------
# pure-JAX reference (self-check only)
# ---------------------------------------------------------------------------
def _reference(x_nchw, params, eps=1e-5):
    B, C, H, W = x_nchw.shape
    sel = x_nchw[:, :, ::4, ::4]
    H4, W4 = sel.shape[2], sel.shape[3]
    q = sel.reshape(B, C, H4 * W4).transpose(0, 2, 1)                  # (B, N, C)
    att = jax.nn.softmax(jnp.einsum("bnc,bmc->bnm", q, q) * (C ** -0.5), axis=-1)
    att = jnp.einsum("bnm,bmc->bnc", att, q)
    att = att.transpose(0, 2, 1).reshape(B, C, H4, W4)
    att = jnp.repeat(jnp.repeat(att, 4, axis=2), 4, axis=3)
    xc = jnp.concatenate([x_nchw, att], axis=1)                        # (B, 2C, H, W)
    y = jnp.einsum("bchw,cd->bdhw", xc, params["w"]) + params["b"].reshape(1, -1, 1, 1)
    s = (params["gamma"] * jax.lax.rsqrt(params["var"] + eps)).reshape(1, -1, 1, 1)
    y = (y - params["mean"].reshape(1, -1, 1, 1)) * s + params["beta"].reshape(1, -1, 1, 1)
    return 0.5 * y * (1.0 + jax.lax.erf(y * _SQRT1_2))


if __name__ == "__main__":
    B, C, H, W = 2, 4, 16, 16
    out_channels = 2 * C  # required: BatchNorm2d(in_channels*2) must match the conv output

    key = jax.random.PRNGKey(0)
    kx, kw, kb, kg, kbe, km, kvv = jax.random.split(key, 7)

    x = jax.random.normal(kx, (B, C, H, W), jnp.float32)
    params = {
        # Conv2d(2C, Cout, kernel_size=1): weight (Cout, 2C, 1, 1) stored here as (2C, Cout)
        "w":     jax.random.normal(kw, (2 * C, out_channels), jnp.float32) * 0.1,
        "b":     jax.random.normal(kb, (1, out_channels), jnp.float32) * 0.1,
        # BatchNorm2d eval-mode parameters / running stats
        "gamma": 1.0 + 0.1 * jax.random.normal(kg, (1, out_channels), jnp.float32),
        "beta":  0.1 * jax.random.normal(kbe, (1, out_channels), jnp.float32),
        "mean":  0.1 * jax.random.normal(km, (1, out_channels), jnp.float32),
        "var":   jax.random.uniform(kvv, (1, out_channels), jnp.float32, 0.5, 1.5),
    }

    ref = _reference(x, params)

    # f32 path, resident-KV attention (the default impl at this size)
    out = mrconv4dsp_forward(x, params, use_bf16=False)
    jax.block_until_ready(out)
    assert out.shape == (B, out_channels, H, W)
    assert bool(jnp.allclose(out, ref, rtol=1e-2, atol=1e-2)), "f32 path mismatch vs reference"

    # bf16 MXU-operand path (native MXU dtype on v5e/v6e/v7x), f32 accumulation
    out_bf16 = mrconv4dsp_forward(x, params, use_bf16=True)
    jax.block_until_ready(out_bf16)
    assert bool(jnp.allclose(out_bf16, ref, rtol=5e-2, atol=5e-2)), "bf16 path mismatch vs reference"

    # flash-tiled attention fallback, forced to a small tile so >1 kv step is exercised
    out_flash = mrconv4dsp_forward(x, params, use_bf16=False, attn_impl="flash", attn_tile=8)
    jax.block_until_ready(out_flash)
    assert bool(jnp.allclose(out_flash, ref, rtol=1e-2, atol=1e-2)), "flash path mismatch vs reference"

    print("KERNEL_OK")
</pallas_src>

<mosaic_0001>
module attributes {stable_mosaic.version = 11 : i64} {
  func.func @_attn_resident_kernel(%arg0: i32, %arg1: i32, %arg2: memref<1x16x4xf32, #tpu.memory_space<vmem>>, %arg3: memref<1x16x4xf32, #tpu.memory_space<vmem>>, %arg4: memref<1x16x4xf32, #tpu.memory_space<vmem>>) attributes {dimension_semantics = [#tpu.dimension_semantics<parallel>, #tpu.dimension_semantics<parallel>], iteration_bounds = array<i64: 2, 1>, scalar_prefetch = 0 : i64, scratch_operands = 0 : i64, tpu.core_type = #tpu.core_type<tc>, window_params = [{transform_indices = @transform_0, window_bounds = array<i64: 1, 16, 4>}, {transform_indices = @transform_1, window_bounds = array<i64: 1, 16, 4>}, {transform_indices = @transform_2, window_bounds = array<i64: 1, 16, 4>}]} {
    %c0 = arith.constant 0 : index
    %c0_0 = arith.constant 0 : index
    %c0_1 = arith.constant 0 : index
    %0 = vector.load %arg2[%c0, %c0_0, %c0_1] : memref<1x16x4xf32, #tpu.memory_space<vmem>>, vector<1x16x4xf32>
    %1 = vector.shape_cast %0 : vector<1x16x4xf32> to vector<16x4xf32>
    %cst = arith.constant 5.000000e-01 : f32
    %2 = vector.broadcast %cst : f32 to vector<16x4xf32>
    %3 = arith.mulf %1, %2 : vector<16x4xf32>
    %c0_2 = arith.constant 0 : index
    %c0_3 = arith.constant 0 : index
    %c0_4 = arith.constant 0 : index
    %4 = vector.load %arg3[%c0_2, %c0_3, %c0_4] : memref<1x16x4xf32, #tpu.memory_space<vmem>>, vector<1x16x4xf32>
    %5 = vector.shape_cast %4 : vector<1x16x4xf32> to vector<16x4xf32>
    %cst_5 = arith.constant dense<0.000000e+00> : vector<16x16xf32>
    %6 = tpu.matmul %3, %5, %cst_5 {dimension_numbers = #tpu.dot_dimension_numbers<[1], [1], [0], [0], [0, 0, 1, 0], [], []>} : vector<16x4xf32>, vector<16x4xf32>, vector<16x16xf32> -> vector<16x16xf32>
    %cst_6 = arith.constant dense<0xFF800000> : vector<16xf32>
    %7 = vector.multi_reduction <maximumf>, %6, %cst_6 [1] : vector<16x16xf32> to vector<16xf32>
    %8 = vector.shape_cast %7 : vector<16xf32> to vector<16x1xf32>
    %9 = vector.broadcast %8 : vector<16x1xf32> to vector<16x16xf32>
    %10 = arith.subf %6, %9 : vector<16x16xf32>
    %11 = math.exp %10 : vector<16x16xf32>
    %cst_7 = arith.constant dense<0.000000e+00> : vector<16xf32>
    %12 = vector.multi_reduction <add>, %11, %cst_7 [1] : vector<16x16xf32> to vector<16xf32>
    %13 = vector.shape_cast %12 : vector<16xf32> to vector<16x1xf32>
    %cst_8 = arith.constant dense<0.000000e+00> : vector<16x4xf32>
    %14 = tpu.matmul %11, %5, %cst_8 {dimension_numbers = #tpu.dot_dimension_numbers<[1], [0], [0], [1], [0, 0, 1, 1], [], []>} : vector<16x16xf32>, vector<16x4xf32>, vector<16x4xf32> -> vector<16x4xf32>
    %15 = vector.broadcast %13 : vector<16x1xf32> to vector<16x4xf32>
    %16 = arith.divf %14, %15 : vector<16x4xf32>
    %c0_9 = arith.constant 0 : index
    %c0_10 = arith.constant 0 : index
    %c0_11 = arith.constant 0 : index
    %17 = vector.load %arg4[%c0_9, %c0_10, %c0_11] : memref<1x16x4xf32, #tpu.memory_space<vmem>>, vector<1x16x4xf32>
    %18 = vector.shape_cast %17 : vector<1x16x4xf32> to vector<16x4xf32>
    %19 = vector.shape_cast %16 : vector<16x4xf32> to vector<1x16x4xf32>
    tpu.vector_store %arg4[%c0_9, %c0_10, %c0_11], %19 {strides = array<i32>} : memref<1x16x4xf32, #tpu.memory_space<vmem>>, vector<1x16x4xf32>,
    return
  }
  func.func @transform_0(%arg0: i32, %arg1: i32) -> (i32, i32, i32) {
    %c0_i32 = arith.constant 0 : i32
    %c0_i32_0 = arith.constant 0 : i32
    return %arg0, %arg1, %c0_i32 : i32, i32, i32
  }
  func.func @transform_1(%arg0: i32, %arg1: i32) -> (i32, i32, i32) {
    %c0_i32 = arith.constant 0 : i32
    %c0_i32_0 = arith.constant 0 : i32
    %c0_i32_1 = arith.constant 0 : i32
    return %arg0, %c0_i32, %c0_i32_0 : i32, i32, i32
  }
  func.func @transform_2(%arg0: i32, %arg1: i32) -> (i32, i32, i32) {
    %c0_i32 = arith.constant 0 : i32
    %c0_i32_0 = arith.constant 0 : i32
    return %arg0, %arg1, %c0_i32 : i32, i32, i32
  }
}

</mosaic_0001>

<bundles_post_ra>
// kernel: tpu_custom_call.1
= control target key start
LH: loop header
LB: loop body
LE: loop exit
PB: predicated region body
PF: predicated region fallthrough
CT: control target
= control target key end

     0   :  { %s521_s9 = smov 0   ;;  %s523_s10 = smov 0   ;;  %s576_s0 = inlined_call_operand.vmem [shape: f32[2,16,4], index: 0, kind: input, shape index: {}]   ;;  %s577_s1 = inlined_call_operand.vmem [shape: f32[2,16,4], index: 1, kind: input, shape index: {}]   ;;  %s578_s2 = inlined_call_operand.vmem [shape: f32[2,16,4], index: 2, kind: output, shape index: {}]  }
   0x1   :  { %s525_s11 = smov 0  }
   0x2 LB: > { %s24_s12 = sadd.s32 1, %s500_s10  ;;  %p428_p0 = scmp.ge.s32.totalorder %s504_s11, 1  ;;  %s504_s11 = sphi %s525_s11, %s12_s11   ;;  %s500_s10 = sphi %s523_s10, %s580_s10   ;;  %s496_s9 = sphi %s521_s9, %s579_s9  }
   0x3   : > { %p26_p1 = scmp.ge.s32.totalorder %s24_s12, 2  ;;  %p143_p2 = scmp.lt.s32.totalorder %s504_s11, 3 }
   0x5   : > { %s582_s12 = smov (%p26_p1, %s24_s12), 0  ;;  %p144_p3 = pnand %p428_p0, %p143_p2 }
   0x6   : > { %p179_p4 = scmp.lt.s32.totalorder (!%p144_p3), %s496_s9, 1 }
   0x7   : > { %147 = sbr.rel (%p144_p3) target bundleno = 436 (0x1b4), region = 28 }
   0xc   : > { %s584_s9 = smov (!%p179_p4, %s496_s9), 1  ;;  %vm209_vm0 = vcmask 31744   ;;  %vm245_vm1 = vcmask 130048  }
   0xd   : > { %s539_s13 = sshll.u32 %s584_s9, 4 }
   0xe   : > { %s192_s16 = scalar_lea.vmem %s577_s1, %s539_s13  ;;  %s186_s19 = scalar_lea.vmem %s576_s0, %s539_s13 }
   0xf   : > { %v208_v0 = vld [vmem:[%s192_s16 + $0x8] sm:$0xff]  ;;  %v203_v2 = vld [vmem:[%s186_s19] sm:$0xff]  ;;  %s201_s22 = scalar_lea.vmem %s578_s2, %s539_s13 }
  0x10   : > { %446 = vmatpush.xpose.msk.msra.mxu2 %vm209_vm0, %v208_v0  ;;  %v204_v1 = vld [vmem:[%s186_s19 + $0x8] sm:$0xff]  ;;  %435 = vmatpush.xpose.msk.msra.mxu0 %vm209_vm0, %v208_v0  ;;  %v207_v3 = vld [vmem:[%s192_s16] sm:$0xff]  ;;  %v205_v5 = vmul.f32 0.5, %v203_v2 }
  0x11   : > { %448 = vmatpush.msra.mxu3 %v208_v0  ;;  %284 = vmatpush.msra.mxu1 %v208_v0  ;;  %v206_v4 = vmul.f32 0.5, %v204_v1 }
  0x13   : > { %449 = vmatpush.msra.mxu3 %v207_v3  ;;  %285 = vmatpush.msra.mxu1 %v207_v3 }
  0x14   : > { %447 = vmatpush.xpose.msk.msra.mxu2 %vm209_vm0, %v207_v3  ;;  %436 = vmatpush.xpose.msk.msra.mxu0 %vm209_vm0, %v207_v3 }
  0x17   : > { %438 = vmatmul.msk.f32.vlgmr.msra.gmra.mxu2 %vm209_vm0, %v206_v4  ;;  %437 = vmatmul.msk.f32.vlgmr.msra.gmra.mxu0 %vm209_vm0, %v205_v5 }
  0x94   : > { %v239_v8 = vpop.f32.mrf.mxu0 }
  0x95   : > { %v246_v9 = vsel %vm245_vm1, %v239_v8, -inf }
  0x9a   : > { %v242_v6 = vpop.f32.mrf.mxu2 }
  0x9b   : > { %v249_v7 = vsel %vm245_vm1, %v242_v6, -inf }
  0x9c   : > { %250 = vmax.xlane.f32.xlu0 %v249_v7 }
  0xa4   : > { %247 = vmax.xlane.f32.xlu0 %v246_v9 }
 0x10f   : > { %v251_v10 = vpop.xlane.xlu0 %250 }
 0x110   : > { %v253_v11 = vsub.f32 %v242_v6, %v251_v10 }
 0x112   : > { %v256_v12 = vmul.f32 1.442695, %v253_v11 }
 0x114   : > { %474 = vpow2.f32 %v256_v12 }
 0x117   : > { %v248_v13 = vpop.xlane.xlu0 %247 }
 0x118   : > { %v252_v14 = vsub.f32 %v239_v8, %v248_v13 }
 0x11a   : > { %v475_v15 = vpop.eup %474  ;;  %v254_v16 = vmul.f32 1.442695, %v252_v14 }
 0x11b   : > { %440 = vmatmul.msk.f32.vlgmr.msra.gmra.mxu3 %vm245_vm1, %v475_v15  ;;  %v261_v19 = vsel %vm245_vm1, %v475_v15, 0.0 }
 0x11c   : > { %476 = vpow2.f32 %v254_v16 }
 0x122   : > { %v477_v17 = vpop.eup %476 }
 0x123   : > { %439 = vmatmul.msk.f32.vlgmr.msra.gmra.mxu1 %vm245_vm1, %v477_v17  ;;  %v258_v18 = vsel %vm245_vm1, %v477_v17, 0.0 }
 0x124   : > { %259 = vadd.xlane.f32.xlu1 %v258_v18 }
 0x12c   : > { %262 = vadd.xlane.f32.xlu1 %v261_v19 }
 0x197   : > { %v260_v20 = vpop.xlane.xlu1 %259 }
 0x198   : > { %478 = vrcp.f32 %v260_v20  ;;  %v304_v25 = vand.u32 2147483648, %v260_v20  ;;  %v302_v27 = vand.u32 2147483647, %v260_v20  ;;  %vm298_vm3 = vweird.f32 %v260_v20 }
 0x19a   : > { %v305_v30 = vor.u32 1.1754944e-38, %v304_v25  ;;  %vm303_vm5 = vcmp.eq.f32.partialorder %v302_v27, 8.507059e+37 }
 0x19e   : > { %v479_v21 = vpop.eup %478  ;;  %v290_v43 = vpop.f32.mrf.mxu3 }
 0x19f   : > { %v294_v22 = vmul.f32 %v479_v21, %v260_v20  ;;  %v263_v23 = vpop.xlane.xlu1 %262  ;;  %vm299_vm2 = vweird.f32 %v479_v21 }
 0x1a0   : > { %480 = vrcp.f32 %v263_v23  ;;  %vm300_vm4 = vmor %vm298_vm3, %vm299_vm2  ;;  %v287_v33 = vpop.f32.mrf.mxu1  ;;  %v319_v37 = vand.u32 2147483648, %v263_v23  ;;  %v317_v39 = vand.u32 2147483647, %v263_v23  ;;  %vm313_vm7 = vweird.f32 %v263_v23 }
 0x1a1   : > { %v295_v24 = vsub.f32 1.0, %v294_v22 }
 0x1a2   : > { %v320_v41 = vor.u32 1.1754944e-38, %v319_v37  ;;  %vm318_vm9 = vcmp.eq.f32.partialorder %v317_v39, 8.507059e+37 }
 0x1a3   : > { %v296_v26 = vmul.f32 %v479_v21, %v295_v24 }
 0x1a5   : > { %v297_v28 = vadd.f32 %v479_v21, %v296_v26 }
 0x1a6   : > { %v481_v29 = vpop.eup %480 }
 0x1a7   : > { %v309_v31 = vmul.f32 %v481_v29, %v263_v23  ;;  %v301_v32 = vsel %vm300_vm4, %v479_v21, %v297_v28  ;;  %vm314_vm6 = vweird.f32 %v481_v29 }
 0x1a8   : > { %v306_v34 = vsel %vm303_vm5, %v305_v30, %v301_v32  ;;  %vm315_vm8 = vmor %vm313_vm7, %vm314_vm6 }
 0x1a9   : > { %v310_v35 = vsub.f32 1.0, %v309_v31  ;;  %v307_v36 = vmul.f32 %v306_v34, %v287_v33 }
 0x1ab   : > { %v311_v38 = vmul.f32 %v481_v29, %v310_v35  ;;  %323 = vst.msk [vmem:[%s201_s22] sm:$0xff] %vm209_vm0, %v307_v36 }
 0x1ad   : > { %v312_v40 = vadd.f32 %v481_v29, %v311_v38 }
 0x1af   : > { %v316_v42 = vsel %vm315_vm8, %v481_v29, %v312_v40 }
 0x1b0   : > { %v321_v44 = vsel %vm318_vm9, %v320_v41, %v316_v42 }
 0x1b1   : > { %v322_v45 = vmul.f32 %v321_v44, %v290_v43 }
 0x1b3   : > { %324 = vst.msk [vmem:[%s201_s22 + $0x8] sm:$0xff] %vm209_vm0, %v322_v45 }
 0x1b4 PF: > { %s12_s11 = sadd.s32 1, %s504_s11   ;;  %s579_s9 = smov %s500_s10 }
 0x1b5   : > { %p9_p5 = scmp.ge.s32.totalorder %s12_s11, 4   ;;  %s580_s10 = smov %s582_s12 }
 0x1b7   :  { %11 = sbr.rel (!%p9_p5) target bundleno = 2 (0x2), region = 61 }

</bundles_post_ra>
